<compile_context>
chip_gen: v5e
topology: v5e:2x2
jax: 0.10.0
libtpu: 0.0.40
codegen_flags: <defaults>
</compile_context>

<pallas_src>
import jax
import jax.numpy as jnp
from jax import lax
from jax.experimental import pallas as pl
from jax.experimental.pallas import tpu as pltpu


def _clip_embedding_kernel(tok_ref, emb_hbm, pos_ref, out_ref, gbuf, sems):
    # tok_ref : (B*T_pad,) int32 in SMEM (scalar prefetch)
    # emb_hbm : (V, D) embedding table, left in HBM (pl.ANY); gathered manually
    # pos_ref : (TT, D) position tile (blocked spec, index j = g % NJ)
    # out_ref : (TT, D) output tile
    # gbuf    : (2, TT, D) VMEM double buffer for gathered rows
    # sems    : (2,) DMA semaphores, one per buffer slot
    p = pl.program_id(0)
    s = pl.program_id(1)
    S = pl.num_programs(1)
    TT, D = out_ref.shape

    def issue_tile(g, slot):
        # Start TT row gathers for global token-tile g into gbuf[slot].
        base = g * TT

        @pl.loop(0, TT)
        def _(r):
            tid = tok_ref[base + r]
            pltpu.make_async_copy(
                emb_hbm.at[pl.ds(tid, 1), :],
                gbuf.at[slot, pl.ds(r, 1), :],
                sems.at[slot],
            ).start()

    def wait_tile(slot):
        # One consolidated wait per slot: the DMA semaphore counts bytes, and the
        # TT issued (1, D) row copies sum to exactly one (TT, D) descriptor.
        pltpu.make_async_copy(
            emb_hbm.at[pl.ds(0, TT), :],
            gbuf.at[slot],
            sems.at[slot],
        ).wait()

    slot = s % 2

    # Bootstrap: first tile of this chunk (once per parallel chunk, not per row).
    @pl.when(s == 0)
    def _():
        issue_tile(p * S, 0)

    # Prefetch the next tile of the SAME chunk into the other slot (may cross
    # batch-row boundaries; never crosses the parallel axis, so megacore
    # splitting stays safe).
    @pl.when(s + 1 < S)
    def _():
        issue_tile(p * S + s + 1, 1 - slot)

    wait_tile(slot)
    out_ref[...] = (gbuf[slot] + pos_ref[...]).astype(out_ref.dtype)


def _pick_tile_tokens(t_pad):
    """Largest multiple-of-8 divisor of t_pad that is <= 128, preferring NJ >= 2."""
    best_multi = None
    best_any = None
    for cand in range(8, min(t_pad, 128) + 1, 8):
        if t_pad % cand == 0:
            best_any = cand
            if t_pad // cand >= 2:
                best_multi = cand
    if best_multi is not None:
        return best_multi
    if best_any is not None:
        return best_any
    return t_pad


def clip_embedding(tokens, token_embedding, position_embedding, *, tile_tokens=None):
    """tokens: (B, T) int; token_embedding: (V, D); position_embedding: (T, D)."""
    B, T = tokens.shape
    V, D = token_embedding.shape
    assert position_embedding.shape == (T, D)

    dtype = token_embedding.dtype
    itemsize = jnp.dtype(dtype).itemsize

    # Pad the token axis to a multiple of 8 so tiles are sublane-aligned and the
    # pipeline has NJ >= 2 tiles (77 -> 80 for real CLIP).
    T_pad = ((T + 7) // 8) * 8
    TT = _pick_tile_tokens(T_pad) if tile_tokens is None else int(tile_tokens)
    assert T_pad % TT == 0 and TT % 8 == 0
    NJ = T_pad // TT
    assert V >= TT, "consolidated wait descriptor requires V >= TT"

    # Flattened global-tile grid: outer parallel split (v7x megacore), inner arbitrary
    # with cross-batch-row prefetch.  P=2 costs nothing on single-TC v5e/v6e.
    G = B * NJ
    P = 2 if (G % 2 == 0 and G >= 4) else 1
    S = G // P

    # Clamp ids (OOB-DMA protection; nn.Embedding would raise instead) and pad the
    # token axis with a valid id (0) -- padded rows are sliced off at the end.
    tok = jnp.clip(tokens.astype(jnp.int32), 0, V - 1)
    if T_pad != T:
        tok = jnp.pad(tok, ((0, 0), (0, T_pad - T)))
    tok_flat = tok.reshape(B * T_pad)

    pos = position_embedding.astype(dtype)
    if T_pad != T:
        pos = jnp.pad(pos, ((0, T_pad - T), (0, 0)))

    # TODO(synk): for bf16/int8/fp8 tables, bitcast the table and gather buffer to a
    # u32 view (V, D*itemsize//4) so each row DMA writes dense packed sublanes.
    # TODO(synk): run-length dedup of repeated pad/EOS token ids on the scalar core
    # would cut the per-row DMA count further for real prompts.

    grid_spec = pltpu.PrefetchScalarGridSpec(
        num_scalar_prefetch=1,
        grid=(P, S),
        in_specs=[
            # Embedding table stays in HBM; gathered manually row-by-row.
            pl.BlockSpec(memory_space=pl.ANY),
            # Position table: one (TT, D) tile per grid step (no in-kernel dyn slice).
            pl.BlockSpec((TT, D), lambda p, s, tok_ids: ((p * S + s) % NJ, 0)),
        ],
        out_specs=pl.BlockSpec((TT, D), lambda p, s, tok_ids: (p * S + s, 0)),
        scratch_shapes=[
            pltpu.VMEM((2, TT, D), dtype),
            pltpu.SemaphoreType.DMA((2,)),
        ],
    )

    cost = pl.CostEstimate(
        flops=int(B * T_pad * D),
        transcendentals=0,
        bytes_accessed=int((2 * B * T_pad * D + T_pad * D) * itemsize + B * T_pad * 4),
    )

    out_flat = pl.pallas_call(
        _clip_embedding_kernel,
        out_shape=jax.ShapeDtypeStruct((B * T_pad, D), dtype),
        grid_spec=grid_spec,
        compiler_params=pltpu.CompilerParams(
            dimension_semantics=("parallel", "arbitrary"),
            # VMEM use is tiny at CLIP sizes; set vmem_limit_bytes explicitly only if
            # this kernel is reused with much larger TT*D.
        ),
        cost_estimate=cost,
    )(tok_flat, token_embedding, pos)

    return out_flat.reshape(B, T_pad, D)[:, :T, :]


if __name__ == "__main__":
    key = jax.random.PRNGKey(0)
    k_tok, k_emb, k_pos, k_tok2, k_pos2 = jax.random.split(key, 5)

    n_vocab, n_embed = 256, 128
    token_embedding = jax.random.normal(k_emb, (n_vocab, n_embed), dtype=jnp.float32)

    # Test 1: aligned shape (B=2, T=16) -> TT=8, NJ=2, G=4, P=2.
    # Exercises the parallel split, per-chunk bootstrap, prefetch, and slot swap.
    batch, n_tokens = 2, 16
    tokens = jax.random.randint(k_tok, (batch, n_tokens), 0, n_vocab, dtype=jnp.int32)
    position_embedding = 0.02 * jax.random.normal(
        k_pos, (n_tokens, n_embed), dtype=jnp.float32
    )
    ref = token_embedding[tokens] + position_embedding[None, :, :]
    out = jax.block_until_ready(clip_embedding(tokens, token_embedding, position_embedding))
    assert out.shape == (batch, n_tokens, n_embed)
    assert jnp.allclose(out, ref, atol=1e-6, rtol=1e-6)

    # Test 2: real-CLIP-like unaligned seq len (B=1, T=77 -> padded to 80, TT=40, NJ=2).
    # Exercises padding, cross-tile prefetch, and the unpadded slice-back.
    batch2, n_tokens2 = 1, 77
    tokens2 = jax.random.randint(k_tok2, (batch2, n_tokens2), 0, n_vocab, dtype=jnp.int32)
    position_embedding2 = 0.02 * jax.random.normal(
        k_pos2, (n_tokens2, n_embed), dtype=jnp.float32
    )
    ref2 = token_embedding[tokens2] + position_embedding2[None, :, :]
    out2 = jax.block_until_ready(
        clip_embedding(tokens2, token_embedding, position_embedding2)
    )
    assert out2.shape == (batch2, n_tokens2, n_embed)
    assert jnp.allclose(out2, ref2, atol=1e-6, rtol=1e-6)

    print("KERNEL_OK")
</pallas_src>

<mosaic_0001>
module attributes {stable_mosaic.version = 11 : i64} {
  func.func @_clip_embedding_kernel(%arg0: i32, %arg1: i32, %arg2: memref<32xi32, #tpu.memory_space<smem>>, %arg3: memref<256x128xf32, #tpu.memory_space<any>>, %arg4: memref<8x128xf32, #tpu.memory_space<vmem>>, %arg5: memref<8x128xf32, #tpu.memory_space<vmem>>, %arg6: memref<2x8x128xf32, #tpu.memory_space<vmem>>, %arg7: memref<2x!tpu.dma_semaphore, #tpu.memory_space<semaphore_mem>>) attributes {dimension_semantics = [#tpu.dimension_semantics<parallel>, #tpu.dimension_semantics<arbitrary>], iteration_bounds = array<i64: 2, 2>, scalar_prefetch = 1 : i64, scratch_operands = 2 : i64, tpu.core_type = #tpu.core_type<tc>, window_params = [{}, {transform_indices = @transform_1, window_bounds = array<i64: 8, 128>}, {transform_indices = @transform_2, window_bounds = array<i64: 8, 128>}]} {
    %c2_i32 = arith.constant 2 : i32
    %c0_i32 = arith.constant 0 : i32
    %0 = arith.cmpi eq, %c2_i32, %c0_i32 : i32
    %c1_i32 = arith.constant 1 : i32
    %1 = arith.select %0, %c1_i32, %c2_i32 : i32
    %2 = arith.remsi %arg1, %1 : i32
    %c0_i32_0 = arith.constant 0 : i32
    %3 = arith.cmpi ne, %2, %c0_i32_0 : i32
    %c0_i32_1 = arith.constant 0 : i32
    %4 = arith.cmpi slt, %2, %c0_i32_1 : i32
    %c0_i32_2 = arith.constant 0 : i32
    %5 = arith.cmpi slt, %1, %c0_i32_2 : i32
    %6 = arith.xori %4, %5 : i1
    %7 = arith.andi %6, %3 : i1
    %8 = arith.addi %2, %1 : i32
    %9 = arith.select %7, %8, %2 : i32
    %c0_i32_3 = arith.constant 0 : i32
    %10 = arith.cmpi eq, %arg1, %c0_i32_3 : i32
    %11 = arith.extui %10 : i1 to i32
    %c0_i32_4 = arith.constant 0 : i32
    %12 = arith.cmpi ne, %11, %c0_i32_4 : i32
    scf.if %12 {
      %c2_i32_17 = arith.constant 2 : i32
      %28 = arith.muli %arg0, %c2_i32_17 : i32
      %c8_i32 = arith.constant 8 : i32
      %29 = arith.muli %28, %c8_i32 : i32
      %c0_i32_18 = arith.constant 0 : i32
      %c8_i32_19 = arith.constant 8 : i32
      %30 = arith.addi %c0_i32_18, %c8_i32_19 : i32
      %c1_i32_20 = arith.constant 1 : i32
      scf.for %arg8 = %c0_i32_18 to %30 step %c1_i32_20  : i32 {
        %c1_i32_22 = arith.constant 1 : i32
        %31 = arith.muli %arg8, %c1_i32_22 : i32
        %c0_i32_23 = arith.constant 0 : i32
        %32 = arith.addi %c0_i32_23, %31 : i32
        %33 = arith.addi %29, %32 : i32
        %34 = arith.index_cast %33 : i32 to index
        %35 = memref.load %arg2[%34] : memref<32xi32, #tpu.memory_space<smem>>
        %c0_i32_24 = arith.constant 0 : i32
        %c0_i32_25 = arith.constant 0 : i32
        %c0_i32_26 = arith.constant 0 : i32
        %36 = tpu.memref_slice %arg3[%35, %c0_i32_26] : memref<256x128xf32, #tpu.memory_space<any>> -> memref<1x128xf32, #tpu.memory_space<any>>
        %c0_i32_27 = arith.constant 0 : i32
        %37 = tpu.memref_slice %arg6[%c0_i32_24, %32, %c0_i32_27] : memref<2x8x128xf32, #tpu.memory_space<vmem>> -> memref<1x1x128xf32, #tpu.memory_space<vmem>>
        %38 = tpu.memref_squeeze %37 : memref<1x1x128xf32, #tpu.memory_space<vmem>> -> memref<1x128xf32, #tpu.memory_space<vmem>>
        %39 = tpu.memref_slice %arg7[%c0_i32_25] : memref<2x!tpu.dma_semaphore, #tpu.memory_space<semaphore_mem>> -> memref<1x!tpu.dma_semaphore, #tpu.memory_space<semaphore_mem>>
        %40 = tpu.memref_squeeze %39 : memref<1x!tpu.dma_semaphore, #tpu.memory_space<semaphore_mem>> -> memref<!tpu.dma_semaphore, #tpu.memory_space<semaphore_mem>>
        tpu.enqueue_dma source(%36 : memref<1x128xf32, #tpu.memory_space<any>>) target(%38 : memref<1x128xf32, #tpu.memory_space<vmem>>) target_semaphore(%40 : memref<!tpu.dma_semaphore, #tpu.memory_space<semaphore_mem>>)
      }
      %c8_i32_21 = arith.constant 8 : i32
    } else {
    }
    %c1_i32_5 = arith.constant 1 : i32
    %13 = arith.addi %arg1, %c1_i32_5 : i32
    %c2_i32_6 = arith.constant 2 : i32
    %14 = arith.cmpi slt, %13, %c2_i32_6 : i32
    %15 = arith.extui %14 : i1 to i32
    %c0_i32_7 = arith.constant 0 : i32
    %16 = arith.cmpi ne, %15, %c0_i32_7 : i32
    scf.if %16 {
      %c2_i32_17 = arith.constant 2 : i32
      %28 = arith.muli %arg0, %c2_i32_17 : i32
      %29 = arith.addi %28, %arg1 : i32
      %c1_i32_18 = arith.constant 1 : i32
      %30 = arith.addi %29, %c1_i32_18 : i32
      %c1_i32_19 = arith.constant 1 : i32
      %31 = arith.subi %c1_i32_19, %9 : i32
      %c8_i32 = arith.constant 8 : i32
      %32 = arith.muli %30, %c8_i32 : i32
      %c0_i32_20 = arith.constant 0 : i32
      %c8_i32_21 = arith.constant 8 : i32
      %33 = arith.addi %c0_i32_20, %c8_i32_21 : i32
      %c1_i32_22 = arith.constant 1 : i32
      scf.for %arg8 = %c0_i32_20 to %33 step %c1_i32_22  : i32 {
        %c1_i32_24 = arith.constant 1 : i32
        %34 = arith.muli %arg8, %c1_i32_24 : i32
        %c0_i32_25 = arith.constant 0 : i32
        %35 = arith.addi %c0_i32_25, %34 : i32
        %36 = arith.addi %32, %35 : i32
        %37 = arith.index_cast %36 : i32 to index
        %38 = memref.load %arg2[%37] : memref<32xi32, #tpu.memory_space<smem>>
        %c0_i32_26 = arith.constant 0 : i32
        %39 = tpu.memref_slice %arg3[%38, %c0_i32_26] : memref<256x128xf32, #tpu.memory_space<any>> -> memref<1x128xf32, #tpu.memory_space<any>>
        %c0_i32_27 = arith.constant 0 : i32
        %40 = tpu.memref_slice %arg6[%31, %35, %c0_i32_27] : memref<2x8x128xf32, #tpu.memory_space<vmem>> -> memref<1x1x128xf32, #tpu.memory_space<vmem>>
        %41 = tpu.memref_squeeze %40 : memref<1x1x128xf32, #tpu.memory_space<vmem>> -> memref<1x128xf32, #tpu.memory_space<vmem>>
        %42 = tpu.memref_slice %arg7[%31] : memref<2x!tpu.dma_semaphore, #tpu.memory_space<semaphore_mem>> -> memref<1x!tpu.dma_semaphore, #tpu.memory_space<semaphore_mem>>
        %43 = tpu.memref_squeeze %42 : memref<1x!tpu.dma_semaphore, #tpu.memory_space<semaphore_mem>> -> memref<!tpu.dma_semaphore, #tpu.memory_space<semaphore_mem>>
        tpu.enqueue_dma source(%39 : memref<1x128xf32, #tpu.memory_space<any>>) target(%41 : memref<1x128xf32, #tpu.memory_space<vmem>>) target_semaphore(%43 : memref<!tpu.dma_semaphore, #tpu.memory_space<semaphore_mem>>)
      }
      %c8_i32_23 = arith.constant 8 : i32
    } else {
    }
    %c0_i32_8 = arith.constant 0 : i32
    %c0_i32_9 = arith.constant 0 : i32
    %17 = tpu.memref_slice %arg3[%c0_i32_8, %c0_i32_9] : memref<256x128xf32, #tpu.memory_space<any>> -> memref<8x128xf32, #tpu.memory_space<any>>
    %c0_i32_10 = arith.constant 0 : i32
    %c0_i32_11 = arith.constant 0 : i32
    %18 = tpu.memref_slice %arg6[%9, %c0_i32_10, %c0_i32_11] : memref<2x8x128xf32, #tpu.memory_space<vmem>> -> memref<1x8x128xf32, #tpu.memory_space<vmem>>
    %19 = tpu.memref_squeeze %18 : memref<1x8x128xf32, #tpu.memory_space<vmem>> -> memref<8x128xf32, #tpu.memory_space<vmem>>
    %20 = tpu.memref_slice %arg7[%9] : memref<2x!tpu.dma_semaphore, #tpu.memory_space<semaphore_mem>> -> memref<1x!tpu.dma_semaphore, #tpu.memory_space<semaphore_mem>>
    %21 = tpu.memref_squeeze %20 : memref<1x!tpu.dma_semaphore, #tpu.memory_space<semaphore_mem>> -> memref<!tpu.dma_semaphore, #tpu.memory_space<semaphore_mem>>
    tpu.wait_dma2 semaphore(%21 : memref<!tpu.dma_semaphore, #tpu.memory_space<semaphore_mem>>) src(%17 : memref<8x128xf32, #tpu.memory_space<any>>) dst(%19 : memref<8x128xf32, #tpu.memory_space<vmem>>)
    %22 = arith.index_cast %9 : i32 to index
    %c0 = arith.constant 0 : index
    %c0_12 = arith.constant 0 : index
    %23 = vector.load %arg6[%22, %c0, %c0_12] : memref<2x8x128xf32, #tpu.memory_space<vmem>>, vector<1x8x128xf32>
    %24 = vector.shape_cast %23 : vector<1x8x128xf32> to vector<8x128xf32>
    %c0_13 = arith.constant 0 : index
    %c0_14 = arith.constant 0 : index
    %25 = vector.load %arg4[%c0_13, %c0_14] : memref<8x128xf32, #tpu.memory_space<vmem>>, vector<8x128xf32>
    %26 = arith.addf %24, %25 : vector<8x128xf32>
    %c0_15 = arith.constant 0 : index
    %c0_16 = arith.constant 0 : index
    %27 = vector.load %arg5[%c0_15, %c0_16] : memref<8x128xf32, #tpu.memory_space<vmem>>, vector<8x128xf32>
    tpu.vector_store %arg5[%c0_15, %c0_16], %26 {strides = array<i32>} : memref<8x128xf32, #tpu.memory_space<vmem>>, vector<8x128xf32>,
    return
  }
  func.func @transform_1(%arg0: i32, %arg1: i32, %arg2: memref<32xi32, #tpu.memory_space<smem>>) -> (i32, i32) {
    %c2_i32 = arith.constant 2 : i32
    %0 = arith.muli %arg0, %c2_i32 : i32
    %1 = arith.addi %0, %arg1 : i32
    %c2_i32_0 = arith.constant 2 : i32
    %c0_i32 = arith.constant 0 : i32
    %2 = arith.cmpi eq, %c2_i32_0, %c0_i32 : i32
    %c1_i32 = arith.constant 1 : i32
    %3 = arith.select %2, %c1_i32, %c2_i32_0 : i32
    %4 = arith.remsi %1, %3 : i32
    %c0_i32_1 = arith.constant 0 : i32
    %5 = arith.cmpi ne, %4, %c0_i32_1 : i32
    %c0_i32_2 = arith.constant 0 : i32
    %6 = arith.cmpi slt, %4, %c0_i32_2 : i32
    %c0_i32_3 = arith.constant 0 : i32
    %7 = arith.cmpi slt, %3, %c0_i32_3 : i32
    %8 = arith.xori %6, %7 : i1
    %9 = arith.andi %8, %5 : i1
    %10 = arith.addi %4, %3 : i32
    %11 = arith.select %9, %10, %4 : i32
    %c0_i32_4 = arith.constant 0 : i32
    %c0_i32_5 = arith.constant 0 : i32
    return %11, %c0_i32_4 : i32, i32
  }
  func.func @transform_2(%arg0: i32, %arg1: i32, %arg2: memref<32xi32, #tpu.memory_space<smem>>) -> (i32, i32) {
    %c2_i32 = arith.constant 2 : i32
    %0 = arith.muli %arg0, %c2_i32 : i32
    %1 = arith.addi %0, %arg1 : i32
    %c0_i32 = arith.constant 0 : i32
    %c0_i32_0 = arith.constant 0 : i32
    return %1, %c0_i32 : i32, i32
  }
}

</mosaic_0001>

<bundles_post_ra>
// kernel: tpu_custom_call.1
= control target key start
LH: loop header
LB: loop body
LE: loop exit
PB: predicated region body
PF: predicated region fallthrough
CT: control target
= control target key end

     0   :  { %s833_s15 = smov [#allocation5]   ;;  %s1129_s0 = inlined_call_operand.hbm [shape: s32[32], index: 0, kind: input, shape index: {}]   ;;  %s1130_s1 = inlined_call_operand.hbm [shape: f32[256,128], index: 1, kind: input, shape index: {}]   ;;  %s1131_s2 = inlined_call_operand.hbm [shape: f32[16,128], index: 2, kind: input, shape index: {}]   ;;  %s1132_s3 = inlined_call_operand.hbm [shape: f32[32,128], index: 3, kind: output, shape index: {}]  }
   0x1   :  { %1140 = sst [smem:[#allocation28_spill]] %s1131_s2  ;;  %s9_s14 = sshll.u32 %s1129_s0, 4  ;;  %s10_s14 = int_to_ptr.hbm [resolvable:$true] %s9_s14 }
   0x2   :  { %12 = dma.hbm_to_smem %s10_s14, 16, %s833_s15, [#allocation4] }
   0x3   :  { %769 = dma.done.wait [#allocation4], 16 }
   0x4   :  { %770 = vsyncadd [#allocation4], 4294967280 }
   0x5   :  { %15 = sfence }
   0x6   :  { %16 = vsyncpa [#allocation7], 0 }
   0x7   :  { %18 = vsyncpa [#allocation7 + $0x1], 0 }
   0x8   :  { %19 = vsyncpa [#allocation8], 0 }
   0x9   :  { %21 = vsyncpa [#allocation8 + $0x1], 0  ;;  %s859_s16 = smov 0   ;;  %s861_s17 = smov 0  }
   0xa   :  { %s863_s18 = smov 0   ;;  %s865_s19 = smov 0  }
   0xb   :  { %s867_s20 = smov 0   ;;  %s869_s0 = smov 0  }
   0xc   :  { %s871_s21 = smov 0   ;;  %s873_s22 = smov 0  }
   0xd   :  { %s875_s23 = smov 0   ;;  %s877_s24 = smov 0  }
   0xe   :  { %s879_s25 = smov 0  }
   0xf LB: > { %1141 = sst [smem:[#allocation20_spill]] %s799_s20  ;;  %s438_s26 = sadd.s32 4294967295, %s823_s25   ;;  %s823_s25 = sphi %s879_s25, %s27_s25   ;;  %s819_s24 = sphi %s877_s24, %s1167_s24   ;;  %s815_s23 = sphi %s875_s23, %s1166_s23   ;;  %s811_s22 = sphi %s873_s22, %s1165_s22   ;;  %s807_s21 = sphi %s871_s21, %s1164_s21   ;;  %s803_s0 = sphi %s869_s0, %s1163_s0   ;;  %s799_s20 = sphi %s867_s20, %s1162_s20   ;;  %s795_s19 = sphi %s865_s19, %s1161_s19   ;;  %s791_s18 = sphi %s863_s18, %s1170_s18   ;;  %s787_s17 = sphi %s861_s17, %s1169_s17   ;;  %s783_s16 = sphi %s859_s16, %s1168_s16  }
  0x10   : > { %1142 = sst [smem:[#allocation21_spill]] %s803_s0  ;;  %s439_s27 = sadd.s32 4294967294, %s823_s25  }
  0x11   : > { %1143 = sst [smem:[#allocation22_spill]] %s815_s23  ;;  %s36_s28 = sadd.s32 1, %s815_s23 }
  0x12   : > { %1144 = sst [smem:[#allocation23_spill]] %s819_s24  ;;  %s39_s29 = sadd.s32 1, %s819_s24 }
  0x13   : > { %p37_p0 = scmp.ge.s32.totalorder %s36_s28, 2  ;;  %s440_s30 = sshll.u32 %s819_s24, 1 }
  0x14   : > { %s44_s4 = sadd.s32 %s815_s23, %s440_s30  ;;  %s74_s5 = sadd.s32 1, %s803_s0 }
  0x15   : > { %s1172_s28 = smov (%p37_p0, %s36_s28), 0  ;;  %s1174_s29 = smov (!%p37_p0, %s39_s29), %s819_s24 }
  0x16   : > { %1145 = sst [smem:[#allocation24_spill]] %s1172_s28  ;;  %s46_s6 = ssub.s32 0, %s44_s4 }
  0x17   : > { %p41_p1 = scmp.ge.s32.totalorder %s1174_s29, 2  ;;  %s441_s7 = smin.u32 %s46_s6, %s44_s4 }
  0x18   : > { %s48_s8 = sand.u32 1, %s441_s7   ;;  %p81_p2 = scmp.ne.s32.totalorder %s803_s0, %s799_s20 }
  0x19   : > { %s1176_s29 = smov (%p41_p1, %s1174_s29), 0  ;;  %p82_p3 = scmp.eq.s32.totalorder %s823_s25, 0 }
  0x1a   : > { %1146 = sst [smem:[#allocation25_spill]] %s1176_s29  ;;  %s444_s9 = sshll.u32 %s1176_s29, 1 }
  0x1b   : > { %p930_p4 = por %p82_p3, %p81_p2  ;;  %p443_p5 = scmp.lt.s32.totalorder %s48_s8, 0 }
  0x1c   : > { %s55_s11 = sadd.s32 2, %s48_s8  ;;  %s58_s12 = sadd.s32 %s444_s9, %s1172_s28 }
  0x1d   : > { %p87_p6 = scmp.ne.s32.totalorder %s799_s20, %s795_s19  ;;  %s1178_s11 = smov (!%p443_p5, %s55_s11), %s48_s8 }
  0x1e   : > { %s60_s13 = ssub.s32 0, %s58_s12  ;;  %p88_p7 = scmp.eq.s32.totalorder %s438_s26, 0 }
  0x1f   : > { %s445_s14 = smin.u32 %s60_s13, %s58_s12  ;;  %s101_s30 = ssub.s32 %s44_s4, %s58_s12 }
  0x20   : > { %s62_s15 = sand.u32 1, %s445_s14   ;;  %p939_p8 = por %p88_p7, %p87_p6 }
  0x21   : > { %p102_p9 = scmp.eq.s32.totalorder %s101_s30, 0  ;;  %s104_s19 = sadd.s32 1, %s791_s18 }
  0x22   : > { %p447_p10 = scmp.lt.s32.totalorder %s62_s15, 0  ;;  %s69_s7 = sadd.s32 2, %s62_s15 }
  0x23   : > { %s945_s8 = scalar_select %p102_p9, %s791_s18, %s104_s19  }
  0x24   : > { %s1180_s7 = smov (!%p447_p10, %s69_s7), %s62_s15  ;;  %p114_p11 = scmp.ne.s32.totalorder %s791_s18, %s787_s17 }
  0x25   : > { %1149 = sst [smem:[#allocation26_spill]] %s945_s8  ;;  %p115_p12 = scmp.eq.s32.totalorder %s438_s26, 3 }
  0x26   : > { %s71_s9 = ssub.s32 %s1178_s11, %s1180_s7  ;;  %p120_p13 = scmp.ne.s32.totalorder %s787_s17, %s783_s16 }
  0x27   : > { %p72_p0 = scmp.eq.s32.totalorder %s71_s9, 0  ;;  %p953_p1 = por %p115_p12, %p114_p11 }
  0x28   : > { %p121_p2 = scmp.eq.s32.totalorder %s439_s27, 3  ;;  %p492_p5 = scmp.lt.s32.totalorder %s823_s25, 4 }
  0x29   : > { %s962_s12 = scalar_select %p72_p0, %s803_s0, %s74_s5  }
  0x2a   : > { %p964_p3 = por %p121_p2, %p120_p13  ;;  %s141_s26 = sand.u32 1, %s803_s0  }
  0x2b   : > { %1151 = sst [smem:[#allocation27_spill]] %s962_s12  ;;  %s457_s14 = sshll.u32 %s1178_s11, 3 }
  0x2c   : > { %s452_s15 = sshll.u32 %s141_s26, 3  ;;  %s1153_s2 = sld [smem:[#allocation28_spill]] }
  0x2d   : > { %s145_s29 = scalar_lea.vmem [#allocation6], %s452_s15  ;;  %p975_p6 = pnand %p492_p5, %p930_p4 }
  0x2e   : > { %s167_s28 = sshll.u32 %s145_s29, 4  ;;  %p458_p7 = scmp.ge.s32.totalorder %s823_s25, 1  ;;  %s168_s28 = int_to_ptr.vmem [resolvable:$true] %s167_s28 }
  0x2f   : > { %p172_p9 = scmp.lt.s32.totalorder %s823_s25, 5  ;;  %s142_s5 = scalar_lea.sflag [#allocation7], %s141_s26 }
  0x30   : > { %p615_p11 = pneg %p975_p6 }
  0x32   : > { %s163_s7 = scalar_lea.hbm %s1153_s2, %s457_s14  ;;  %s618_s10 = scalar_lea.hbm %s1153_s2, 16 }
  0x33   : > { %s165_s9 = sshll.u32 %s163_s7, 4  ;;  %s166_s9 = int_to_ptr.hbm [resolvable:$true] %s165_s9 }
  0x34   : > { %s611_s11 = sshra.s32 %s166_s9, 4  ;;  %s612_s11 = int_to_ptr.hbm [resolvable:$true] %s611_s11 }
  0x35   : > { %s613_s24 = scalar_lea.hbm %s612_s11, 8  ;;  %p619_p4 = scmp.lt.s32.totalorder %s612_s11, %s1153_s2 }
  0x36   : > { %p614_p10 = scmp.ne.s32.totalorder %s612_s11, %s613_s24  ;;  %p620_p0 = scmp.lt.s32.totalorder %s618_s10, %s613_s24 }
  0x38   : > { %p616_p12 = pnand %p615_p11, %p614_p10  ;;  %p621_p2 = por %p620_p0, %p619_p4 }
  0x3a   : > { %p617_p13 = pneg %p616_p12 }
  0x3c   : > { %p622_p5 = pnand %p621_p2, %p617_p13 }
  0x3e   : > { %625 = shalt.err (!%p622_p5)
}
  0x3f   : > { %487 = dma.hbm_to_vmem [thread:$0]  (!%p975_p6), %s166_s9, 128, %s168_s28, %s142_s5  }
  0x40   : > { %p173_p10 = pnand %p458_p7, %p172_p9 }
  0x41   : > { %s178_s26 = sand.u32 (!%p173_p10), 1, %s799_s20  }
  0x42   : > { %176 = sbr.rel (%p173_p10) target bundleno = 184 (0xb8), region = 24  ;;  %s996_s19 = sshll.u32 (!%p173_p10), %s178_s26, 3 }
  0x43   : > { %s179_s7 = scalar_lea.sflag (!%p173_p10), [#allocation7], %s178_s26 }
  0x47   : > { %772 = dma.done.wait (%p939_p8), %s179_s7, 128  }
  0x48   : > { %774 = vsyncadd (%p939_p8), %s179_s7, 4294967168  ;;  %s1136_s28 = sand.u32 1, %s787_s17   ;;  %p218_p6 = scmp.lt.s32.totalorder %s807_s21, 0 }
  0x49   : > { %s1007_s9 = sshll.u32 %s1136_s28, 3  ;;  %s219_s27 = ssub.s32 0, %s807_s21 }
  0x4a   : > { %s461_s5 = smin.u32 %s807_s21, %s219_s27  ;;  %p464_p8 = scmp.ne.s32.totalorder %s807_s21, 0 }
  0x4b   : > { %s221_s11 = sand.u32 1, %s461_s5   ;;  %s1016_s15 = smov (!%p464_p8), 0  }
  0x4c   : > { %s222_s29 = ssub.s32 0, %s221_s11  ;;  %233 = sbr.rel (%p464_p8) target bundleno = 119 (0x77), region = 32 }
  0x4d   : > { %s1182_s29 = smov (!%p218_p6, %s222_s29), %s221_s11 }
  0x4e   : > { %p463_p7 = scmp.lt.s32.totalorder %s1182_s29, 0  ;;  %s228_s14 = sadd.s32 2, %s1182_s29 }
  0x50   : > { %s1184_s14 = smov (!%p463_p7, %s228_s14), %s1182_s29 }
  0x51 LB: >> { %s1155_s10 = sshll.u32 %s811_s22, 4  ;;  %s244_s7 = scalar_lea.vmem [#allocation2], %s827_s15  ;;  %s827_s15 = sphi %s1016_s15, %s240_s15  }
  0x52   : >> { %s241_s30 = sadd.s32 %s827_s15, %s1155_s10  ;;  %s254_s27 = sshll.u32 %s244_s7, 4  ;;  %s255_s27 = int_to_ptr.vmem [resolvable:$true] %s254_s27 }
  0x53   : >> { %s242_s26 = sld [smem:[#allocation5 + %s241_s30]]  ;;  %s645_s12 = scalar_lea.hbm %s1130_s1, 256 }
  0x59   : >> { %s243_s29 = scalar_lea.hbm %s1130_s1, %s242_s26 }
  0x5a   : >> { %s252_s28 = sshll.u32 %s243_s29, 4  ;;  %s253_s28 = int_to_ptr.hbm [resolvable:$true] %s252_s28 }
  0x5b   : >> { %s641_s24 = sshra.s32 %s253_s28, 4  ;;  %s642_s24 = int_to_ptr.hbm [resolvable:$true] %s641_s24 }
  0x5c   : >> { %s643_s6 = scalar_lea.hbm %s642_s24, 1  ;;  %p646_p11 = scmp.lt.s32.totalorder %s642_s24, %s1130_s1 }
  0x5d   : >> { %p644_p9 = scmp.ne.s32.totalorder %s642_s24, %s643_s6  ;;  %p647_p12 = scmp.lt.s32.totalorder %s645_s12, %s643_s6 }
  0x5f   : >> { %p648_p13 = por %p647_p12, %p646_p11 }
  0x61   : >> { %p649_p4 = pnand %p648_p13, %p644_p9 }
  0x63   : >> { %652 = shalt.err (!%p649_p4)  }
  0x64   : >> { %s653_s30 = sshra.s32 %s255_s27, 4  ;;  %s834_s7 = smov [#allocation2]   ;;  %s654_s30 = int_to_ptr.vmem [resolvable:$true] %s653_s30 }
  0x65   : >> { %s655_s26 = scalar_lea.vmem %s654_s30, 1  ;;  %s657_s5 = scalar_lea.vmem %s834_s7, 16 }
  0x66   : >> { %p656_p0 = scmp.ne.s32.totalorder %s654_s30, %s655_s26  ;;  %p658_p2 = scmp.lt.s32.totalorder %s654_s30, [#allocation2] }
  0x67   : >> { %p659_p5 = scmp.lt.s32.totalorder %s657_s5, %s655_s26 }
  0x69   : >> { %p660_p10 = por %p659_p5, %p658_p2 }
  0x6b   : >> { %p661_p6 = pnand %p660_p10, %p656_p0 }
  0x6d   : >> { %664 = shalt.err (!%p661_p6)  }
  0x6e   : >> { %257 = dma.hbm_to_vmem [thread:$0]  %s253_s28, 16, %s255_s27, [#allocation3] }
  0x6f   : >> { %s240_s15 = sadd.s32 1, %s827_s15  }
  0x70   : >> { %p237_p7 = scmp.ge.s32.totalorder %s240_s15, 8  }
  0x72   : > { %239 = sbr.rel (!%p237_p7) target bundleno = 81 (0x51), region = 107 }
  0x77 PF: > { %s258_s2 = sadd.s32 1, %s807_s21 }
  0x78   : > { %p466_p8 = scmp.ge.s32.totalorder %s258_s2, 2 }
  0x79   : > { %s467_s0 = sshll.u32 (!%p466_p8), %s811_s22, 1  ;;  %s266_s23 = ssub.s32 (!%p466_p8), 1, %s1184_s14 }
  0x7a   : > { %262 = sbr.rel (%p466_p8) target bundleno = 164 (0xa4), region = 47  ;;  %s264_s12 = sadd.s32 (!%p466_p8), %s807_s21, %s467_s0 }
  0x7b   : > { %s478_s24 = sshll.u32 (!%p466_p8), %s264_s12, 3  ;;  %s1043_s28 = smov (!%p466_p8), 0  }
  0x7c   : > { %s1041_s6 = sadd.s32 (!%p466_p8), 8, %s478_s24 }
  0x7f LB: >> { %s469_s10 = sshll.u32 %s266_s23, 3  ;;  %s274_s15 = sadd.s32 %s831_s28, %s1041_s6  ;;  %s831_s28 = sphi %s1043_s28, %s273_s28  }
  0x80   : >> { %s278_s27 = sadd.s32 %s831_s28, %s469_s10  ;;  %s275_s11 = sld [smem:[#allocation5 + %s274_s15]] }
  0x81   : >> { %s279_s29 = scalar_lea.vmem [#allocation2], %s278_s27  ;;  %s280_s0 = scalar_lea.sflag [#allocation3], %s266_s23 }
  0x82   : >> { %s290_s30 = sshll.u32 %s279_s29, 4  ;;  %s669_s10 = scalar_lea.hbm %s1130_s1, 256  ;;  %s291_s30 = int_to_ptr.vmem [resolvable:$true] %s290_s30 }
  0x86   : >> { %s276_s5 = scalar_lea.hbm %s1130_s1, %s275_s11 }
  0x87   : >> { %s288_s2 = sshll.u32 %s276_s5, 4  ;;  %s289_s2 = int_to_ptr.hbm [resolvable:$true] %s288_s2 }
  0x88   : >> { %s665_s12 = sshra.s32 %s289_s2, 4  ;;  %s666_s12 = int_to_ptr.hbm [resolvable:$true] %s665_s12 }
  0x89   : >> { %s667_s24 = scalar_lea.hbm %s666_s12, 1  ;;  %p670_p11 = scmp.lt.s32.totalorder %s666_s12, %s1130_s1 }
  0x8a   : >> { %p668_p9 = scmp.ne.s32.totalorder %s666_s12, %s667_s24  ;;  %p671_p12 = scmp.lt.s32.totalorder %s669_s10, %s667_s24 }
  0x8c   : >> { %p672_p13 = por %p671_p12, %p670_p11 }
  0x8e   : >> { %p673_p4 = pnand %p672_p13, %p668_p9 }
  0x90   : >> { %676 = shalt.err (!%p673_p4)  }
  0x91   : >> { %s677_s11 = sshra.s32 %s291_s30, 4  ;;  %s835_s26 = smov [#allocation2]   ;;  %s678_s11 = int_to_ptr.vmem [resolvable:$true] %s677_s11 }
  0x92   : >> { %s679_s29 = scalar_lea.vmem %s678_s11, 1  ;;  %s681_s7 = scalar_lea.vmem %s835_s26, 16 }
  0x93   : >> { %p680_p0 = scmp.ne.s32.totalorder %s678_s11, %s679_s29  ;;  %p682_p2 = scmp.lt.s32.totalorder %s678_s11, [#allocation2] }
  0x94   : >> { %p683_p5 = scmp.lt.s32.totalorder %s681_s7, %s679_s29 }
  0x96   : >> { %p684_p10 = por %p683_p5, %p682_p2 }
  0x98   : >> { %p685_p6 = pnand %p684_p10, %p680_p0 }
  0x9a   : >> { %688 = shalt.err (!%p685_p6)  }
  0x9b   : >> { %293 = dma.hbm_to_vmem [thread:$0]  %s289_s2, 16, %s291_s30, %s280_s0 }
  0x9c   : >> { %s273_s28 = sadd.s32 1, %s831_s28  }
  0x9d   : >> { %p270_p7 = scmp.ge.s32.totalorder %s273_s28, 8  }
  0x9f   : > { %272 = sbr.rel (!%p270_p7) target bundleno = 127 (0x7f), region = 118 }
  0xa4 PF: > { %s470_s20 = sshll.u32 %s1184_s14, 3  ;;  %s296_s5 = scalar_lea.sflag [#allocation3], %s1184_s14 }
  0xa5   : > { %s295_s8 = scalar_lea.vmem [#allocation2], %s470_s20 }
  0xa6   : > { %775 = dma.done.wait %s296_s5, 128 }
  0xa7   : > { %776 = vsyncadd %s296_s5, 4294967168  ;;  %s472_s30 = sshll.u32 %s811_s22, 1  ;;  %s1156_s6 = scalar_lea.vmem [#allocation9], %s1007_s9  ;;  %v300_v0 = vld [vmem:[%s295_s8] sm:$0xff] }
  0xa8   : > { %s313_s2 = sadd.s32 %s807_s21, %s472_s30  ;;  %s319_s24 = sshll.u32 %s1156_s6, 4  ;;  %s320_s24 = int_to_ptr.vmem [resolvable:$true] %s319_s24 }
  0xa9   : > { %s473_s0 = sshll.u32 %s313_s2, 3  ;;  %s1157_s14 = scalar_lea.vmem [#allocation6], %s996_s19 }
  0xaa   : > { %s317_s23 = scalar_lea.hbm %s1132_s3, %s473_s0  ;;  %v301_v1 = vld [vmem:[%s1157_s14] sm:$0xff]  ;;  %s1158_s15 = smov %s1156_s6 }
  0xab   : > { %s321_s10 = sshll.u32 %s317_s23, 4  ;;  %v302_v2 = vadd.f32 %v301_v1, %v300_v0  ;;  %s1159_s27 = sand.u32 1, %s787_s17   ;;  %s322_s10 = int_to_ptr.hbm [resolvable:$true] %s321_s10 }
  0xac   : > { %s305_s22 = scalar_lea.sflag [#allocation8], %s1159_s27  ;;  %s703_s21 = sshra.s32 %s322_s10, 4  ;;  %s704_s21 = int_to_ptr.hbm [resolvable:$true] %s703_s21 }
  0xad   : > { %303 = vst [vmem:[%s1158_s15] sm:$0xff] %v302_v2  ;;  %s705_s11 = scalar_lea.hbm %s704_s21, 8  ;;  %s709_s7 = scalar_lea.hbm %s1132_s3, 32 }
  0xae   : > { %p706_p8 = scmp.ne.s32.totalorder %s704_s21, %s705_s11  ;;  %p710_p12 = scmp.lt.s32.totalorder %s704_s21, %s1132_s3 }
  0xaf   : > { %p711_p13 = scmp.lt.s32.totalorder %s709_s7, %s705_s11 }
  0xb0   : > { %p707_p9 = pnand %p706_p8, %p953_p1 }
  0xb1   : > { %p712_p4 = por %p711_p13, %p710_p12 }
  0xb2   : > { %p708_p11 = pneg %p707_p9 }
  0xb4   : > { %p713_p0 = pnand %p712_p4, %p708_p11 }
  0xb6   : > { %716 = shalt.err (!%p713_p0)
}
  0xb7   : > { %482 = dma.vmem_to_hbm [thread:$0]  (%p953_p1), %s320_s24, 128, %s322_s10, %s305_s22  }
  0xb8 PF: > { %p493_p2 = scmp.ge.s32.totalorder %s823_s25, 2  ;;  %s333_s9 = sand.u32 1, %s783_s16  }
  0xb9   : > { %s334_s8 = scalar_lea.sflag [#allocation8], %s333_s9 }
  0xba   : > { %p489_p5 = pnand %p493_p2, %p964_p3 }
  0xbc   : > { %p490_p10 = pneg %p489_p5 }
  0xbe   : > { %778 = dma.done.wait (%p490_p10), %s334_s8, 128  }
  0xbf   : > { %780 = vsyncadd (%p490_p10), %s334_s8, 4294967168  ;;  %s27_s25 = sadd.s32 1, %s823_s25   ;;  %s1160_s5 = sld [smem:[#allocation26_spill]] }
  0xc0   : > { %p24_p6 = scmp.ge.s32.totalorder %s27_s25, 6   ;;  %s1161_s19 = sld [smem:[#allocation20_spill]] }
  0xc1   : > { %s1162_s20 = sld [smem:[#allocation21_spill]]  ;;  %s1168_s16 = smov %s787_s17 }
  0xc2   : > { %s1163_s0 = sld [smem:[#allocation27_spill]]  ;;  %s1169_s17 = smov %s791_s18 }
  0xc3   : > { %s1164_s21 = sld [smem:[#allocation22_spill]]  ;;  %26 = sbr.rel (!%p24_p6) target bundleno = 15 (0xf), region = 129 }
  0xc4   : > { %s1165_s22 = sld [smem:[#allocation23_spill]] }
  0xc5   : > { %s1166_s23 = sld [smem:[#allocation24_spill]]  ;;  %s1170_s18 = smov %s1160_s5 }
  0xc6   : > { %s1167_s24 = sld [smem:[#allocation25_spill]] }
  0xc8   :  { %340 = vsyncpa [#allocation7], 1 }
  0xc9   :  { %342 = vsyncpa [#allocation7 + $0x1], 1 }
  0xca   :  { %343 = vsyncpa [#allocation8], 1 }
  0xcb   :  { %345 = vsyncpa [#allocation8 + $0x1], 1 }
  0xcc   :  { %346 = vsyncmov [#allocation3] }
  0xcf   :  { %s347_s4 = vpop.sfrf %346 }
  0xd0   :  { %p476_p1 = scmp.ne.s32.totalorder %s347_s4, 0 }
  0xd2   :  { %351 = shalt.err (%p476_p1)  }
  0xd3   :  { %353 = vsyncmov [#allocation3 + $0x1] }
  0xd6   :  { %s354_s13 = vpop.sfrf %353 }
  0xd7   :  { %p477_p3 = scmp.ne.s32.totalorder %s354_s13, 0 }
  0xd9   :  { %358 = shalt.err (%p477_p3)  }

</bundles_post_ra>
